<compile_context>
chip_gen: v5e
topology: v5e:2x2
jax: 0.10.0
libtpu: 0.0.40
codegen_flags: <defaults>
</compile_context>

<pallas_src>
import functools
import math

import jax
import jax.numpy as jnp
from jax import lax
from jax.experimental import pallas as pl
from jax.experimental.pallas import tpu as pltpu


def _label_smoothing_kernel(x_ref, tgt_ref, sum_all_ref, sum_tgt_ref, *,
                            rows_total, row_tile, strip, blocks_per_split):
    c = pl.program_id(0)          # parallel split axis (TensorCores)
    i = pl.program_id(1)          # reduction axis over row blocks

    @pl.when(i == 0)
    def _init():
        sum_all_ref[...] = jnp.zeros_like(sum_all_ref)
        sum_tgt_ref[...] = jnp.zeros_like(sum_tgt_ref)

    v = x_ref.shape[1]
    x_dtype = x_ref.dtype
    n_strips = row_tile // strip
    # f32 inputs: force full-precision MXU passes; bf16 inputs already accumulate exactly in f32.
    precision = (lax.Precision.HIGHEST if jnp.dtype(x_dtype).itemsize >= 4
                 else lax.Precision.DEFAULT)

    # Hoisted per-invocation constants (JAX does not CSE broadcast_in_dim - build once).
    col = lax.broadcasted_iota(jnp.int32, (strip, v), 1)                           # class index
    sel = (lax.broadcasted_iota(jnp.int32, (8, strip), 0) == 0).astype(x_dtype)    # row-0 selector

    block_row0 = (c * blocks_per_split + i) * row_tile
    is_full = block_row0 + row_tile <= rows_total

    def run(mask_rows):
        def body(s, carry):
            r0 = pl.multiple_of(s * strip, strip)
            x_s = x_ref[pl.ds(r0, strip), :]        # native dtype straight off the DMA
            t_s = tgt_ref[pl.ds(r0, strip), :]      # (strip, 1) int32, -1 on padded rows
            if mask_rows:
                xb = jnp.where(t_s >= 0, x_s, 0)    # zero garbage rows (tail / dead blocks)
            else:
                xb = x_s                            # steady state: no per-element masking
            xt = jnp.where(col == t_s, x_s, 0)      # target column only (tgt=-1 never matches)
            # MXU row-reductions: row 0 of each (8, V) result holds the column sums.
            sum_all_ref[...] += jnp.dot(sel, xb, precision=precision,
                                        preferred_element_type=jnp.float32)
            sum_tgt_ref[...] += jnp.dot(sel, xt, precision=precision,
                                        preferred_element_type=jnp.float32)
            return carry
        lax.fori_loop(0, n_strips, body, 0)

    @pl.when(is_full)
    def _fast():
        run(mask_rows=False)

    @pl.when(jnp.logical_not(is_full))
    def _tail():
        run(mask_rows=True)


def label_smoothing_loss(x, target, *, size, smoothing=0.0,
                         num_splits=None, max_block_bytes=None,
                         vmem_limit_bytes=None):
    """x: (B, T, V) log-probs, target: (B, T) int indices -> scalar KL-div (sum) loss."""
    B, T, V = x.shape
    assert V == size
    R = B * T

    x2 = x.reshape(R, V)
    if x2.dtype == jnp.float64:
        x2 = x2.astype(jnp.float32)
    tgt2 = target.reshape(R, 1).astype(jnp.int32)

    # ---- per-device defaults ------------------------------------------------------------
    kind = ""
    vmem_cap = 64 * 1024 * 1024
    try:
        kind = jax.devices()[0].device_kind.lower()
    except Exception:
        pass
    try:
        vmem_cap = int(getattr(pltpu.get_tpu_info(), "vmem_capacity_bytes", vmem_cap))
    except Exception:
        pass
    if num_splits is None:
        # 1 TensorCore per chip on v5e / v6e; 2 on megacore (v4 / v5p) and v7x.
        multi_tc = any(t in kind for t in ("v4", "v5p", "v7")) and "lite" not in kind
        num_splits = 2 if multi_tc else 1
    big_vmem = vmem_cap >= 100 * 1024 * 1024            # 128 MiB chips (v5e / v6e)
    if max_block_bytes is None:
        max_block_bytes = (16 if big_vmem else 8) * 1024 * 1024
    if vmem_limit_bytes is None:
        vmem_limit_bytes = (64 if big_vmem else 32) * 1024 * 1024

    # ---- tiling ---------------------------------------------------------------------------
    itemsize = x2.dtype.itemsize
    padded_v = -(-V // 128) * 128                       # lane-padded row width in VMEM
    row_bytes = padded_v * itemsize
    r_align = -(-R // 8) * 8
    # rows per inner fori_loop strip: bounds the masked-copy temporary to ~256 KiB
    strip = max(8, min(512, (256 * 1024 // row_bytes) // 8 * 8))
    strip = min(strip, r_align)
    budget_rows = max(strip, (max_block_bytes // row_bytes) // strip * strip)
    row_tile = min(budget_rows, -(-r_align // strip) * strip)
    nb_total = -(-R // row_tile)                        # blocks containing real rows
    blocks_per_split = -(-nb_total // num_splits)
    last_block = nb_total - 1
    r_pad = num_splits * blocks_per_split * row_tile

    # Only the tiny int32 target array is ever padded; x is streamed as-is from HBM.
    if r_pad != R:
        tgt2 = jnp.pad(tgt2, ((0, r_pad - R), (0, 0)), constant_values=-1)

    confidence = 1.0 - smoothing
    smooth_val = smoothing / (size - 1)
    ent = 0.0                                           # sum_{p>0} p*log(p) per row
    if confidence > 0.0:
        ent += confidence * math.log(confidence)
    if smooth_val > 0.0:
        ent += (size - 1) * smooth_val * math.log(smooth_val)
    c_total = R * ent

    kernel = functools.partial(
        _label_smoothing_kernel,
        rows_total=R, row_tile=row_tile, strip=strip,
        blocks_per_split=blocks_per_split)

    sum_all, sum_tgt = pl.pallas_call(
        kernel,
        out_shape=(jax.ShapeDtypeStruct((num_splits * 8, V), jnp.float32),
                   jax.ShapeDtypeStruct((num_splits * 8, V), jnp.float32)),
        grid_spec=pltpu.PrefetchScalarGridSpec(
            num_scalar_prefetch=0,
            grid=(num_splits, blocks_per_split),
            in_specs=[
                # x: clamp so any fully-dead trailing block re-reads a valid block; its
                # contribution is zeroed in-kernel via tgt == -1.
                pl.BlockSpec((row_tile, V),
                             lambda c, i: (jnp.minimum(c * blocks_per_split + i,
                                                       last_block), 0)),
                # tgt is padded to the full logical extent; never clamp it.
                pl.BlockSpec((row_tile, 1),
                             lambda c, i: (c * blocks_per_split + i, 0)),
            ],
            out_specs=(pl.BlockSpec((8, V), lambda c, i: (c, 0)),
                       pl.BlockSpec((8, V), lambda c, i: (c, 0))),
        ),
        compiler_params=pltpu.CompilerParams(
            dimension_semantics=("parallel", "arbitrary"),
            vmem_limit_bytes=vmem_limit_bytes,
        ),
        cost_estimate=pl.CostEstimate(
            flops=4 * R * V,
            transcendentals=0,
            bytes_accessed=R * V * itemsize + r_pad * 4 + 2 * num_splits * 8 * V * 4,
        ),
    )(x2, tgt2)

    s_all = jnp.sum(sum_all, dtype=jnp.float32)
    s_tgt = jnp.sum(sum_tgt, dtype=jnp.float32)
    weighted = smooth_val * s_all + (confidence - smooth_val) * s_tgt
    return jnp.asarray(c_total, jnp.float32) - weighted


def _reference_loss(x, target, size, smoothing):
    confidence = 1.0 - smoothing
    smooth_val = smoothing / (size - 1)
    oh = jax.nn.one_hot(target, size, dtype=jnp.float32)
    true_dist = oh * confidence + (1.0 - oh) * smooth_val
    kl = jnp.where(true_dist > 0.0,
                   true_dist * (jnp.log(jnp.maximum(true_dist, 1e-30)) - x),
                   0.0)
    return jnp.sum(kl)


if __name__ == "__main__":
    key = jax.random.PRNGKey(0)
    B, T, V = 2, 8, 32            # batch, seq, vocab ("size" of LabelSmoothing)
    smoothing = 0.1

    k1, k2 = jax.random.split(key)
    logits = jax.random.normal(k1, (B, T, V), dtype=jnp.float32)
    x = jax.nn.log_softmax(logits, axis=-1)             # module expects log-probabilities
    target = jax.random.randint(k2, (B, T), 0, V, dtype=jnp.int32)

    loss = label_smoothing_loss(x, target, size=V, smoothing=smoothing)
    loss = jax.block_until_ready(loss)

    ref = _reference_loss(x, target, V, smoothing)
    assert jnp.allclose(loss, ref, rtol=1e-5, atol=1e-4), (loss, ref)

    print("KERNEL_OK")
</pallas_src>

<mosaic_0001>
module attributes {stable_mosaic.version = 11 : i64} {
  func.func @_label_smoothing_kernel(%arg0: i32, %arg1: i32, %arg2: memref<16x32xf32, #tpu.memory_space<vmem>>, %arg3: memref<16x1xi32, #tpu.memory_space<vmem>>, %arg4: memref<8x32xf32, #tpu.memory_space<vmem>>, %arg5: memref<8x32xf32, #tpu.memory_space<vmem>>) attributes {dimension_semantics = [#tpu.dimension_semantics<parallel>, #tpu.dimension_semantics<arbitrary>], iteration_bounds = array<i64: 1, 1>, scalar_prefetch = 0 : i64, scratch_operands = 0 : i64, tpu.core_type = #tpu.core_type<tc>, window_params = [{transform_indices = @transform_0, window_bounds = array<i64: 16, 32>}, {transform_indices = @transform_1, window_bounds = array<i64: 16, 1>}, {transform_indices = @transform_2, window_bounds = array<i64: 8, 32>}, {transform_indices = @transform_3, window_bounds = array<i64: 8, 32>}]} {
    %c0_i32 = arith.constant 0 : i32
    %0 = arith.cmpi eq, %arg1, %c0_i32 : i32
    %1 = arith.extui %0 : i1 to i32
    %c0_i32_0 = arith.constant 0 : i32
    %2 = arith.cmpi ne, %1, %c0_i32_0 : i32
    scf.if %2 {
      %cst = arith.constant 0.000000e+00 : f32
      %19 = vector.broadcast %cst : f32 to vector<8x32xf32>
      %c0 = arith.constant 0 : index
      %c0_6 = arith.constant 0 : index
      %20 = vector.load %arg4[%c0, %c0_6] : memref<8x32xf32, #tpu.memory_space<vmem>>, vector<8x32xf32>
      tpu.vector_store %arg4[%c0, %c0_6], %19 {strides = array<i32>} : memref<8x32xf32, #tpu.memory_space<vmem>>, vector<8x32xf32>,
      %cst_7 = arith.constant 0.000000e+00 : f32
      %21 = vector.broadcast %cst_7 : f32 to vector<8x32xf32>
      %c0_8 = arith.constant 0 : index
      %c0_9 = arith.constant 0 : index
      %22 = vector.load %arg5[%c0_8, %c0_9] : memref<8x32xf32, #tpu.memory_space<vmem>>, vector<8x32xf32>
      tpu.vector_store %arg5[%c0_8, %c0_9], %21 {strides = array<i32>} : memref<8x32xf32, #tpu.memory_space<vmem>>, vector<8x32xf32>,
    } else {
    }
    %3 = tpu.iota {dimensions = array<i32: 1>} : vector<16x32xi32>
    %4 = tpu.iota {dimensions = array<i32: 0>} : vector<8x16xi32>
    %c0_i32_1 = arith.constant 0 : i32
    %5 = vector.broadcast %c0_i32_1 : i32 to vector<8x16xi32>
    %6 = arith.cmpi eq, %4, %5 : vector<8x16xi32>
    %7 = arith.extui %6 : vector<8x16xi1> to vector<8x16xi32>
    %8 = arith.sitofp %7 : vector<8x16xi32> to vector<8x16xf32>
    %c1_i32 = arith.constant 1 : i32
    %9 = arith.muli %arg0, %c1_i32 : i32
    %10 = arith.addi %9, %arg1 : i32
    %c16_i32 = arith.constant 16 : i32
    %11 = arith.muli %10, %c16_i32 : i32
    %c16_i32_2 = arith.constant 16 : i32
    %12 = arith.addi %11, %c16_i32_2 : i32
    %c16_i32_3 = arith.constant 16 : i32
    %13 = arith.cmpi sle, %12, %c16_i32_3 : i32
    %14 = arith.extui %13 : i1 to i32
    %c0_i32_4 = arith.constant 0 : i32
    %15 = arith.cmpi ne, %14, %c0_i32_4 : i32
    scf.if %15 {
      %c0_i32_6 = arith.constant 0 : i32
      %c16_i32_7 = arith.constant 16 : i32
      %19 = arith.muli %c0_i32_6, %c16_i32_7 : i32
      %20 = tpu.assume_multiple %19, 16 : i32
      %21 = arith.index_cast %20 : i32 to index
      %c0 = arith.constant 0 : index
      %22 = vector.load %arg2[%21, %c0] : memref<16x32xf32, #tpu.memory_space<vmem>>, vector<16x32xf32>
      %23 = arith.index_cast %20 : i32 to index
      %c0_8 = arith.constant 0 : index
      %24 = vector.load %arg3[%23, %c0_8] : memref<16x1xi32, #tpu.memory_space<vmem>>, vector<16x1xi32>
      %25 = vector.broadcast %24 : vector<16x1xi32> to vector<16x32xi32>
      %26 = arith.cmpi eq, %3, %25 : vector<16x32xi32>
      %c0_i32_9 = arith.constant 0 : i32
      %27 = arith.sitofp %c0_i32_9 : i32 to f32
      %28 = vector.broadcast %27 : f32 to vector<16x32xf32>
      %29 = arith.select %26, %22, %28 : vector<16x32xi1>, vector<16x32xf32>
      %c0_10 = arith.constant 0 : index
      %c0_11 = arith.constant 0 : index
      %30 = vector.load %arg4[%c0_10, %c0_11] : memref<8x32xf32, #tpu.memory_space<vmem>>, vector<8x32xf32>
      %cst = arith.constant dense<0.000000e+00> : vector<8x32xf32>
      %31 = tpu.matmul %8, %22, %cst {dimension_numbers = #tpu.dot_dimension_numbers<[1], [0], [0], [1], [0, 0, 1, 1], [], []>, precision = #tpu.contract_precision<fp32>} : vector<8x16xf32>, vector<16x32xf32>, vector<8x32xf32> -> vector<8x32xf32>
      %32 = arith.addf %30, %31 : vector<8x32xf32>
      %c0_12 = arith.constant 0 : index
      %c0_13 = arith.constant 0 : index
      %33 = vector.load %arg4[%c0_12, %c0_13] : memref<8x32xf32, #tpu.memory_space<vmem>>, vector<8x32xf32>
      tpu.vector_store %arg4[%c0_12, %c0_13], %32 {strides = array<i32>} : memref<8x32xf32, #tpu.memory_space<vmem>>, vector<8x32xf32>,
      %c0_14 = arith.constant 0 : index
      %c0_15 = arith.constant 0 : index
      %34 = vector.load %arg5[%c0_14, %c0_15] : memref<8x32xf32, #tpu.memory_space<vmem>>, vector<8x32xf32>
      %cst_16 = arith.constant dense<0.000000e+00> : vector<8x32xf32>
      %35 = tpu.matmul %8, %29, %cst_16 {dimension_numbers = #tpu.dot_dimension_numbers<[1], [0], [0], [1], [0, 0, 1, 1], [], []>, precision = #tpu.contract_precision<fp32>} : vector<8x16xf32>, vector<16x32xf32>, vector<8x32xf32> -> vector<8x32xf32>
      %36 = arith.addf %34, %35 : vector<8x32xf32>
      %c0_17 = arith.constant 0 : index
      %c0_18 = arith.constant 0 : index
      %37 = vector.load %arg5[%c0_17, %c0_18] : memref<8x32xf32, #tpu.memory_space<vmem>>, vector<8x32xf32>
      tpu.vector_store %arg5[%c0_17, %c0_18], %36 {strides = array<i32>} : memref<8x32xf32, #tpu.memory_space<vmem>>, vector<8x32xf32>,
      %c1_i32_19 = arith.constant 1 : i32
    } else {
    }
    %true = arith.constant true
    %16 = arith.xori %13, %true : i1
    %17 = arith.extui %16 : i1 to i32
    %c0_i32_5 = arith.constant 0 : i32
    %18 = arith.cmpi ne, %17, %c0_i32_5 : i32
    scf.if %18 {
      %c0_i32_6 = arith.constant 0 : i32
      %c16_i32_7 = arith.constant 16 : i32
      %19 = arith.muli %c0_i32_6, %c16_i32_7 : i32
      %20 = tpu.assume_multiple %19, 16 : i32
      %21 = arith.index_cast %20 : i32 to index
      %c0 = arith.constant 0 : index
      %22 = vector.load %arg2[%21, %c0] : memref<16x32xf32, #tpu.memory_space<vmem>>, vector<16x32xf32>
      %23 = arith.index_cast %20 : i32 to index
      %c0_8 = arith.constant 0 : index
      %24 = vector.load %arg3[%23, %c0_8] : memref<16x1xi32, #tpu.memory_space<vmem>>, vector<16x1xi32>
      %c0_i32_9 = arith.constant 0 : i32
      %25 = vector.broadcast %c0_i32_9 : i32 to vector<16x1xi32>
      %26 = arith.cmpi sge, %24, %25 : vector<16x1xi32>
      %c0_i32_10 = arith.constant 0 : i32
      %27 = arith.sitofp %c0_i32_10 : i32 to f32
      %28 = vector.shape_cast %26 : vector<16x1xi1> to vector<16x1xi1>
      %29 = vector.broadcast %28 : vector<16x1xi1> to vector<16x32xi1>
      %30 = vector.broadcast %27 : f32 to vector<16x32xf32>
      %31 = arith.select %29, %22, %30 : vector<16x32xi1>, vector<16x32xf32>
      %32 = vector.broadcast %24 : vector<16x1xi32> to vector<16x32xi32>
      %33 = arith.cmpi eq, %3, %32 : vector<16x32xi32>
      %c0_i32_11 = arith.constant 0 : i32
      %34 = arith.sitofp %c0_i32_11 : i32 to f32
      %35 = vector.broadcast %34 : f32 to vector<16x32xf32>
      %36 = arith.select %33, %22, %35 : vector<16x32xi1>, vector<16x32xf32>
      %c0_12 = arith.constant 0 : index
      %c0_13 = arith.constant 0 : index
      %37 = vector.load %arg4[%c0_12, %c0_13] : memref<8x32xf32, #tpu.memory_space<vmem>>, vector<8x32xf32>
      %cst = arith.constant dense<0.000000e+00> : vector<8x32xf32>
      %38 = tpu.matmul %8, %31, %cst {dimension_numbers = #tpu.dot_dimension_numbers<[1], [0], [0], [1], [0, 0, 1, 1], [], []>, precision = #tpu.contract_precision<fp32>} : vector<8x16xf32>, vector<16x32xf32>, vector<8x32xf32> -> vector<8x32xf32>
      %39 = arith.addf %37, %38 : vector<8x32xf32>
      %c0_14 = arith.constant 0 : index
      %c0_15 = arith.constant 0 : index
      %40 = vector.load %arg4[%c0_14, %c0_15] : memref<8x32xf32, #tpu.memory_space<vmem>>, vector<8x32xf32>
      tpu.vector_store %arg4[%c0_14, %c0_15], %39 {strides = array<i32>} : memref<8x32xf32, #tpu.memory_space<vmem>>, vector<8x32xf32>,
      %c0_16 = arith.constant 0 : index
      %c0_17 = arith.constant 0 : index
      %41 = vector.load %arg5[%c0_16, %c0_17] : memref<8x32xf32, #tpu.memory_space<vmem>>, vector<8x32xf32>
      %cst_18 = arith.constant dense<0.000000e+00> : vector<8x32xf32>
      %42 = tpu.matmul %8, %36, %cst_18 {dimension_numbers = #tpu.dot_dimension_numbers<[1], [0], [0], [1], [0, 0, 1, 1], [], []>, precision = #tpu.contract_precision<fp32>} : vector<8x16xf32>, vector<16x32xf32>, vector<8x32xf32> -> vector<8x32xf32>
      %43 = arith.addf %41, %42 : vector<8x32xf32>
      %c0_19 = arith.constant 0 : index
      %c0_20 = arith.constant 0 : index
      %44 = vector.load %arg5[%c0_19, %c0_20] : memref<8x32xf32, #tpu.memory_space<vmem>>, vector<8x32xf32>
      tpu.vector_store %arg5[%c0_19, %c0_20], %43 {strides = array<i32>} : memref<8x32xf32, #tpu.memory_space<vmem>>, vector<8x32xf32>,
      %c1_i32_21 = arith.constant 1 : i32
    } else {
    }
    return
  }
  func.func @transform_0(%arg0: i32, %arg1: i32) -> (i32, i32) {
    %c1_i32 = arith.constant 1 : i32
    %0 = arith.muli %arg0, %c1_i32 : i32
    %1 = arith.addi %0, %arg1 : i32
    %c0_i32 = arith.constant 0 : i32
    %2 = arith.minsi %1, %c0_i32 : i32
    %c0_i32_0 = arith.constant 0 : i32
    %c0_i32_1 = arith.constant 0 : i32
    return %2, %c0_i32_0 : i32, i32
  }
  func.func @transform_1(%arg0: i32, %arg1: i32) -> (i32, i32) {
    %c1_i32 = arith.constant 1 : i32
    %0 = arith.muli %arg0, %c1_i32 : i32
    %1 = arith.addi %0, %arg1 : i32
    %c0_i32 = arith.constant 0 : i32
    %c0_i32_0 = arith.constant 0 : i32
    return %1, %c0_i32 : i32, i32
  }
  func.func @transform_2(%arg0: i32, %arg1: i32) -> (i32, i32) {
    %c0_i32 = arith.constant 0 : i32
    %c0_i32_0 = arith.constant 0 : i32
    return %arg0, %c0_i32 : i32, i32
  }
  func.func @transform_3(%arg0: i32, %arg1: i32) -> (i32, i32) {
    %c0_i32 = arith.constant 0 : i32
    %c0_i32_0 = arith.constant 0 : i32
    return %arg0, %c0_i32 : i32, i32
  }
}

</mosaic_0001>

<bundles_post_ra>
// kernel: tpu_custom_call.1
= control target key start
LH: loop header
LB: loop body
LE: loop exit
PB: predicated region body
PF: predicated region fallthrough
CT: control target
= control target key end

     0   :  { %9 = vsyncpa [#allocation3], 0  ;;  %v908_v2 = vmov 0   ;;  %s961_s0 = inlined_call_operand.vmem [shape: f32[16,32], index: 0, kind: input, shape index: {}]   ;;  %s962_s1 = inlined_call_operand.vmem [shape: s32[16,1], index: 1, kind: input, shape index: {}]   ;;  %s963_s2 = inlined_call_operand.hbm [shape: f32[8,32], index: 2, kind: output, shape index: {0}]   ;;  %s964_s3 = inlined_call_operand.hbm [shape: f32[8,32], index: 3, kind: output, shape index: {1}]  }
   0x1   :  { %v93_v0 = vld [vmem:[%s962_s1 + $0x8] sm:$0xff]  ;;  %855 = vset.pattern.permute.xlu0 %v908_v2 }
   0x2   :  { %v91_v1 = vld [vmem:[%s961_s0 + $0x8] sm:$0xff] }
   0x3   :  { %v123_v3 = vand.u32 4294901760, %v91_v1 }
   0x4   :  { %10 = vsyncpa [#allocation5], 0  ;;  %98 = vperm.xlu0 %855, %v93_v0   ;;  %v92_v6 = vld [vmem:[%s962_s1] sm:$0xff]  ;;  %v76_v11 = vlaneseq  ;;  %v909_v15 = vmov 0.0   ;;  %vm105_vm1 = vcmask 130048   ;;  %vm73_vm4 = vcmask 261120  }
   0x5   :  { %v151_v4 = vsub.f32 %v91_v1, %v123_v3  ;;  %124 = vmatpush.msra.mxu0 %v123_v3  ;;  %208 = vmatpush.msra.mxu3 %v123_v3  ;;  %v90_v9 = vld [vmem:[%s961_s0] sm:$0xff]  ;;  %74 = vst.msk [vmem:[#allocation2] sm:$0xff] %vm73_vm4, %v909_v15  ;;  %s910_s0 = smov [#allocation2]   ;;  %s801_s22 = sshll.u32 %s963_s2, 4  ;;  %s802_s22 = int_to_ptr.hbm [resolvable:$true] %s801_s22 }
   0x6   :  { %v125_v10 = vand.u32 4294901760, %v90_v9  ;;  %v79_v13 = vshrl.u32 %v76_v11, 7  ;;  %v77_v24 = vand.u32 127, %v76_v11  ;;  %75 = vst.msk [vmem:[#allocation4] sm:$0xff] %vm73_vm4, %v909_v15  ;;  %s799_s1 = sshll.u32 %s910_s0, 4  ;;  %s911_s23 = smov [#allocation4]   ;;  %s800_s1 = int_to_ptr.vmem [resolvable:$true] %s799_s1 }
   0x7   :  { %v152_v5 = vand.u32 4294901760, %v151_v4  ;;  %183 = vmatpush.msra.mxu2 %v151_v4  ;;  %s810_s2 = sshll.u32 %s911_s23, 4  ;;  %s812_s26 = sshll.u32 %s964_s3, 4  ;;  %s811_s2 = int_to_ptr.vmem [resolvable:$true] %s810_s2  ;;  %s813_s26 = int_to_ptr.hbm [resolvable:$true] %s812_s26 }
   0x8   :  { %v157_v12 = vsub.f32 %v90_v9, %v125_v10  ;;  %126 = vmatpush.msra.mxu0 %v125_v10  ;;  %210 = vmatpush.msra.mxu3 %v125_v10  ;;  %vm80_vm0 = vcmp.eq.s32.totalorder %v79_v13, 0 }
   0x9   :  { %v153_v7 = vsub.f32 %v151_v4, %v152_v5  ;;  %v838_v16 = vsel %vm80_vm0, 1.0, %v909_v15 }
   0xa   :  { %235 = vmatpush.msrb.mxu0 %v152_v5  ;;  %v158_v14 = vand.u32 4294901760, %v157_v12  ;;  %186 = vmatpush.msra.mxu2 %v157_v12  ;;  %v107_v18 = vsel %vm105_vm1, %v838_v16, 0 }
   0xb   :  { %v154_v8 = vand.u32 4294901760, %v153_v7  ;;  %v128_v20 = vsub.f32 %v107_v18, %v107_v18 }
   0xc   :  { %95 = vperm.xlu0 %855, %v92_v6   ;;  %v159_v17 = vsub.f32 %v157_v12, %v158_v14  ;;  %239 = vmatpush.msrb.mxu0 %v158_v14  ;;  %v104_v49 = vld [vmem:[#allocation2] sm:$0xff] }
   0xd   :  { %155 = vmatpush.msra.mxu1 %v154_v8  ;;  %v129_v21 = vand.u32 4294901760, %v128_v20  ;;  %189 = vmatmul.f32.vlgmr.msra.gmra.mxu2 %v128_v20  ;;  %v271_v61 = vld [vmem:[#allocation4] sm:$0xff] }
   0xe   :  { %v160_v19 = vand.u32 4294901760, %v159_v17 }
   0xf   :  { %v130_v22 = vsub.f32 %v128_v20, %v129_v21  ;;  %214 = vmatmul.f32.vlgmr.msra.gmra.mxu3 %v129_v21 }
  0x10   :  { %161 = vmatpush.msra.mxu1 %v160_v19 }
  0x11   :  { %839 = vmatmul.msk.f32.vlgmr.msra.gmra.mxu1 %vm105_vm1, %v838_v16  ;;  %v131_v23 = vand.u32 4294901760, %v130_v22 }
  0x12   :  { %260 = vmatpush.msrb.mxu1 %v123_v3 }
  0x13   :  { %132 = vmatmul.f32.vlgmr.msra.gmra.mxu0 %v131_v23 }
  0x14   :  { %262 = vmatpush.msrb.mxu1 %v125_v10 }
  0x19   :  { %841 = vmatmul.msk.f32.vlgmr.msrb.gmra.mxu1 %vm105_vm1, %v838_v16 }
  0x1b   :  { %840 = vmatmul.msk.f32.vlgmr.msrb.gmra.mxu0 %vm105_vm1, %v838_v16 }
  0x76   :  { %v99_v25 = vpop.permute.xlu0 %98 }
  0x77   :  { %vm101_vm2 = vcmp.eq.s32.totalorder %v77_v24, %v99_v25 }
  0x78   :  { %v103_v26 = vsel %vm101_vm2, %v91_v1, 0.0 }
  0x79   :  { %v286_v27 = vand.u32 4294901760, %v103_v26 }
  0x7b   :  { %v314_v28 = vsub.f32 %v103_v26, %v286_v27  ;;  %287 = vmatpush.msrb.mxu2 %v286_v27  ;;  %371 = vmatpush.msra.mxu1 %v286_v27 }
  0x7d   :  { %346 = vmatpush.msra.mxu0 %v314_v28  ;;  %v315_v29 = vand.u32 4294901760, %v314_v28 }
  0x7e   :  { %v96_v30 = vpop.permute.xlu0 %95 }
  0x7f   :  { %vm100_vm3 = vcmp.eq.s32.totalorder %v77_v24, %v96_v30  ;;  %v316_v31 = vsub.f32 %v314_v28, %v315_v29 }
  0x80   :  { %v102_v32 = vsel %vm100_vm3, %v90_v9, 0.0 }
  0x81   :  { %v288_v33 = vand.u32 4294901760, %v102_v32  ;;  %v317_v34 = vand.u32 4294901760, %v316_v31 }
  0x83   :  { %v320_v35 = vsub.f32 %v102_v32, %v288_v33  ;;  %289 = vmatpush.msrb.mxu2 %v288_v33  ;;  %318 = vmatpush.msrb.mxu3 %v317_v34 }
  0x84   :  { %373 = vmatpush.msra.mxu1 %v288_v33  ;;  %295 = vmatmul.f32.vlgmr.msrb.gmra.mxu2 %v131_v23 }
  0x85   :  { %398 = vmatpush.msra.mxu2 %v315_v29  ;;  %349 = vmatpush.msra.mxu0 %v320_v35  ;;  %v321_v36 = vand.u32 4294901760, %v320_v35 }
  0x86   :  { %352 = vmatmul.f32.vlgmr.msra.gmra.mxu0 %v128_v20  ;;  %377 = vmatmul.f32.vlgmr.msra.gmra.mxu1 %v129_v21 }
  0x87   :  { %402 = vmatpush.msra.mxu2 %v321_v36  ;;  %v322_v37 = vsub.f32 %v320_v35, %v321_v36 }
  0x89   :  { %v323_v38 = vand.u32 4294901760, %v322_v37 }
  0x8b   :  { %324 = vmatpush.msrb.mxu3 %v323_v38 }
  0x8c   :  { %842 = vmatmul.msk.f32.vlgmr.msrb.gmra.mxu3 %vm105_vm1, %v838_v16  ;;  %843 = vmatmul.msk.f32.vlgmr.msra.gmra.mxu2 %vm105_vm1, %v838_v16 }
  0x8d   :  { %423 = vmatpush.msra.mxu3 %v286_v27 }
  0x8e   :  { %v164_v39 = vpop.f32.mrf.mxu1 }
  0x8f   :  { %425 = vmatpush.msra.mxu3 %v288_v33 }
  0x90   :  { %v133_v40 = vpop.f32.mrf.mxu0  ;;  %v190_v41 = vpop.f32.mrf.mxu2 }
  0x91   :  { %v165_v42 = vadd.f32 %v164_v39, %v133_v40 }
  0x92   :  { %v215_v43 = vpop.f32.mrf.mxu3 }
  0x93   :  { %v191_v44 = vadd.f32 %v190_v41, %v165_v42 }
  0x94   :  { %844 = vmatmul.msk.f32.vlgmr.msra.gmra.mxu3 %vm105_vm1, %v838_v16 }
  0x95   :  { %v216_v45 = vadd.f32 %v215_v43, %v191_v44 }
  0x96   :  { %v265_v47 = vpop.f32.mrf.mxu1 }
  0x98   :  { %v242_v46 = vpop.f32.mrf.mxu0 }
  0x99   :  { %v243_v48 = vadd.f32 %v242_v46, %v216_v45 }
  0x9b   :  { %v266_v50 = vadd.f32 %v265_v47, %v243_v48 }
  0x9d   :  { %v268_v51 = vadd.f32 %v266_v50, %v104_v49 }
  0x9f   :  { %270 = vst.msk [vmem:[#allocation2] sm:$0xff] %vm73_vm4, %v268_v51 }
  0xa0   :  { %804 = dma.vmem_to_hbm [thread:$0]  %s800_s1, 128, %s802_s22, [#allocation3]  }
 0x103   :  { %v353_v54 = vpop.f32.mrf.mxu0  ;;  %v378_v56 = vpop.f32.mrf.mxu1 }
 0x107   :  { %v296_v52 = vpop.f32.mrf.mxu2 }
 0x10f   :  { %v327_v53 = vpop.f32.mrf.mxu3  ;;  %v405_v58 = vpop.f32.mrf.mxu2 }
 0x110   :  { %v328_v55 = vadd.f32 %v327_v53, %v296_v52 }
 0x112   :  { %v354_v57 = vadd.f32 %v353_v54, %v328_v55 }
 0x114   :  { %v379_v59 = vadd.f32 %v378_v56, %v354_v57 }
 0x116   :  { %v406_v60 = vadd.f32 %v405_v58, %v379_v59 }
 0x117   :  { %v428_v62 = vpop.f32.mrf.mxu3 }
 0x118   :  { %v429_v63 = vadd.f32 %v428_v62, %v406_v60 }
 0x11a   :  { %v431_v0 = vadd.f32 %v429_v63, %v271_v61 }
 0x11c   :  { %432 = vst.msk [vmem:[#allocation4] sm:$0xff] %vm73_vm4, %v431_v0 }
 0x11d   :  { %815 = dma.vmem_to_hbm [thread:$0]  %s811_s2, 128, %s813_s26, [#allocation5]  }
 0x11e   :  { %904 = dma.done.wait [#allocation3], 128  }
 0x11f   :  { %905 = vsyncadd [#allocation3], 4294967168 }
 0x120   :  { %906 = dma.done.wait [#allocation5], 128  }
 0x121   :  { %907 = vsyncadd [#allocation5], 4294967168 }
 0x122   :  { %824 = vsyncpa [#allocation3], 1 }
 0x123   :  { %825 = vsyncpa [#allocation5], 1 }

</bundles_post_ra>
